<compile_context>
chip_gen: v6e
topology: v6e:2x2x1
jax: 0.10.0
libtpu: 0.0.40
codegen_flags: <defaults>
</compile_context>

<pallas_src>
import functools

import jax
import jax.numpy as jnp
from jax.experimental import pallas as pl
from jax.experimental.pallas import tpu as pltpu

LANE = 128      # padded hidden lane width (full MXU tile)
OUT_DIM = 3     # true output features
OUT_PAD = 8     # output padded to an 8-wide DMA granule (narrow store)
BM_MAX = 2048   # max batch tile rows (~8 MiB VMEM total incl. double buffers)


def mlp_kernel(x_ref, w1_ref, b1_ref, w2_ref, b2_ref, w3_ref, b3_ref, o_ref):
    x = x_ref[...]          # (bm, 3)
    w1 = w1_ref[...]        # (3, 128)

    # Layer 1 on the VPU: K=3, so three broadcast FMAs beat a ~98%-padded MXU tile.
    h1 = (x[:, 0:1] * w1[0:1, :]
          + x[:, 1:2] * w1[1:2, :]
          + x[:, 2:3] * w1[2:3, :]
          + b1_ref[...])
    h1 = jnp.maximum(h1, 0.0)                                      # (bm, 128)

    # Layer 2: full 128x128 MXU tile.
    h2 = jnp.dot(h1, w2_ref[...], preferred_element_type=jnp.float32) + b2_ref[...]
    h2 = jnp.maximum(h2, 0.0)                                      # (bm, 128)

    # Output layer: w3/b3 pre-padded to only 8 columns, so the HBM writeback is
    # (bm, 8) — padded hidden lanes (cols 100..127) of h2 hit zero rows of w3.
    out = jnp.dot(h2, w3_ref[...], preferred_element_type=jnp.float32) + b3_ref[...]
    o_ref[...] = out.astype(o_ref.dtype)                           # (bm, 8)


def pad_params(w1, b1, w2, b2, w3, b3):
    """Zero-pad weights/biases once, outside the forward path.

    Weights are stored as (in_features, out_features)."""
    f32 = jnp.float32
    fin = w1.shape[0]
    w1p = jnp.zeros((fin, LANE), f32).at[:, : w1.shape[1]].set(w1)
    b1p = jnp.zeros((1, LANE), f32).at[:, : b1.shape[1]].set(b1)
    w2p = jnp.zeros((LANE, LANE), f32).at[: w2.shape[0], : w2.shape[1]].set(w2)
    b2p = jnp.zeros((1, LANE), f32).at[:, : b2.shape[1]].set(b2)
    w3p = jnp.zeros((LANE, OUT_PAD), f32).at[: w3.shape[0], : w3.shape[1]].set(w3)
    b3p = jnp.zeros((1, OUT_PAD), f32).at[:, : b3.shape[1]].set(b3)
    return w1p, b1p, w2p, b2p, w3p, b3p


def _pick_batch_tile(B):
    """Adaptive batch tile: minimize row padding, amortize per-step overhead,
    and keep >= 2 blocks for v7x megacore once the batch is big enough."""
    n_blocks = max(1, -(-B // BM_MAX))      # cdiv(B, BM_MAX)
    if n_blocks == 1 and B > 512:
        n_blocks = 2                        # let both v7x TensorCores work
    bm = max(8, ((-(-B // n_blocks) + 7) // 8) * 8)
    n_blocks = -(-B // bm)
    return bm, n_blocks


def mlp_forward(x, padded_params):
    w1p, b1p, w2p, b2p, w3p, b3p = padded_params
    B, fin = x.shape                          # fin == 3

    bm, n_blocks = _pick_batch_tile(B)
    Bp = n_blocks * bm
    xp = x if Bp == B else jnp.zeros((Bp, fin), x.dtype).at[:B].set(x)

    out_padded = pl.pallas_call(
        mlp_kernel,
        out_shape=jax.ShapeDtypeStruct((Bp, OUT_PAD), jnp.float32),
        grid=(n_blocks,),
        in_specs=[
            pl.BlockSpec((bm, fin), lambda i: (i, 0)),        # x tile, pipelined
            pl.BlockSpec((fin, LANE), lambda i: (0, 0)),      # w1 (resident)
            pl.BlockSpec((1, LANE), lambda i: (0, 0)),        # b1 (resident)
            pl.BlockSpec((LANE, LANE), lambda i: (0, 0)),     # w2 (resident)
            pl.BlockSpec((1, LANE), lambda i: (0, 0)),        # b2 (resident)
            pl.BlockSpec((LANE, OUT_PAD), lambda i: (0, 0)),  # w3 (resident, 8 cols)
            pl.BlockSpec((1, OUT_PAD), lambda i: (0, 0)),     # b3 (resident)
        ],
        out_specs=pl.BlockSpec((bm, OUT_PAD), lambda i: (i, 0)),
        compiler_params=pltpu.CompilerParams(
            dimension_semantics=("parallel",)),
    )(xp, w1p, b1p, w2p, b2p, w3p, b3p)

    # Slice off (< 8) padded rows and the 5 padded output lanes.
    return out_padded[:B, :OUT_DIM]


def init_params(key):
    """Deterministic init mimicking PyTorch nn.Linear default (uniform +/- 1/sqrt(fan_in)).

    Weights are stored as (in_features, out_features)."""
    def linear(key, fan_in, fan_out):
        kw, kb = jax.random.split(key)
        bound = 1.0 / jnp.sqrt(fan_in)
        w = jax.random.uniform(kw, (fan_in, fan_out), jnp.float32, -bound, bound)
        b = jax.random.uniform(kb, (1, fan_out), jnp.float32, -bound, bound)
        return w, b

    k1, k2, k3 = jax.random.split(key, 3)
    w1, b1 = linear(k1, 3, 100)
    w2, b2 = linear(k2, 100, 100)
    w3, b3 = linear(k3, 100, 3)
    return w1, b1, w2, b2, w3, b3


def _reference(x, w1, b1, w2, b2, w3, b3):
    h = jnp.maximum(x @ w1 + b1, 0.0)
    h = jnp.maximum(h @ w2 + b2, 0.0)
    return h @ w3 + b3


if __name__ == "__main__":
    key = jax.random.PRNGKey(0)
    kx, kp = jax.random.split(key)
    w1, b1, w2, b2, w3, b3 = init_params(kp)

    # Pad weights ONCE (hoisted out of the per-call path).
    padded = pad_params(w1, b1, w2, b2, w3, b3)
    fwd = jax.jit(mlp_forward)

    # Small toy batch (matches the module's nn.Linear(3, ...) input convention).
    B = 8
    x = jax.random.normal(kx, (B, 3), jnp.float32)
    out = jax.block_until_ready(fwd(x, padded))
    ref = _reference(x, w1, b1, w2, b2, w3, b3)
    assert out.shape == (B, 3)
    assert jnp.allclose(out, ref, atol=1e-4, rtol=1e-4)

    # Exercise the adaptive multi-block path: B=520 -> 2 blocks of 264 rows
    # (only 8 padded rows, vs. 504 in the previous fixed-bm version).
    B2 = 520
    x2 = jax.random.normal(kx, (B2, 3), jnp.float32)
    out2 = jax.block_until_ready(fwd(x2, padded))
    ref2 = _reference(x2, w1, b1, w2, b2, w3, b3)
    assert out2.shape == (B2, 3)
    assert jnp.allclose(out2, ref2, atol=1e-4, rtol=1e-4)

    print("KERNEL_OK")
</pallas_src>

<mosaic_0001>
module attributes {stable_mosaic.version = 11 : i64} {
  func.func @mlp_kernel(%arg0: i32, %arg1: memref<8x3xf32, #tpu.memory_space<vmem>>, %arg2: memref<3x128xf32, #tpu.memory_space<vmem>>, %arg3: memref<1x128xf32, #tpu.memory_space<vmem>>, %arg4: memref<128x128xf32, #tpu.memory_space<vmem>>, %arg5: memref<1x128xf32, #tpu.memory_space<vmem>>, %arg6: memref<128x8xf32, #tpu.memory_space<vmem>>, %arg7: memref<1x8xf32, #tpu.memory_space<vmem>>, %arg8: memref<8x8xf32, #tpu.memory_space<vmem>>) attributes {dimension_semantics = [#tpu.dimension_semantics<parallel>], iteration_bounds = array<i64: 1>, scalar_prefetch = 0 : i64, scratch_operands = 0 : i64, tpu.core_type = #tpu.core_type<tc>, window_params = [{transform_indices = @transform_0, window_bounds = array<i64: 8, 3>}, {pipeline_mode = #tpu.pipeline_mode<synchronous>, transform_indices = @transform_1, window_bounds = array<i64: 3, 128>}, {pipeline_mode = #tpu.pipeline_mode<synchronous>, transform_indices = @transform_2, window_bounds = array<i64: 1, 128>}, {pipeline_mode = #tpu.pipeline_mode<synchronous>, transform_indices = @transform_3, window_bounds = array<i64: 128, 128>}, {pipeline_mode = #tpu.pipeline_mode<synchronous>, transform_indices = @transform_4, window_bounds = array<i64: 1, 128>}, {pipeline_mode = #tpu.pipeline_mode<synchronous>, transform_indices = @transform_5, window_bounds = array<i64: 128, 8>}, {pipeline_mode = #tpu.pipeline_mode<synchronous>, transform_indices = @transform_6, window_bounds = array<i64: 1, 8>}, {transform_indices = @transform_7, window_bounds = array<i64: 8, 8>}]} {
    %c0 = arith.constant 0 : index
    %c0_0 = arith.constant 0 : index
    %0 = vector.load %arg1[%c0, %c0_0] : memref<8x3xf32, #tpu.memory_space<vmem>>, vector<8x3xf32>
    %c0_1 = arith.constant 0 : index
    %c0_2 = arith.constant 0 : index
    %1 = vector.load %arg2[%c0_1, %c0_2] : memref<3x128xf32, #tpu.memory_space<vmem>>, vector<3x128xf32>
    %2 = vector.extract_strided_slice %0 {offsets = [0, 0], sizes = [8, 1], strides = [1, 1]} : vector<8x3xf32> to vector<8x1xf32>
    %3 = vector.extract_strided_slice %1 {offsets = [0, 0], sizes = [1, 128], strides = [1, 1]} : vector<3x128xf32> to vector<1x128xf32>
    %4 = vector.broadcast %2 : vector<8x1xf32> to vector<8x128xf32>
    %5 = vector.broadcast %3 : vector<1x128xf32> to vector<8x128xf32>
    %6 = arith.mulf %4, %5 : vector<8x128xf32>
    %7 = vector.extract_strided_slice %0 {offsets = [0, 1], sizes = [8, 1], strides = [1, 1]} : vector<8x3xf32> to vector<8x1xf32>
    %8 = vector.extract_strided_slice %1 {offsets = [1, 0], sizes = [1, 128], strides = [1, 1]} : vector<3x128xf32> to vector<1x128xf32>
    %9 = vector.broadcast %7 : vector<8x1xf32> to vector<8x128xf32>
    %10 = vector.broadcast %8 : vector<1x128xf32> to vector<8x128xf32>
    %11 = arith.mulf %9, %10 : vector<8x128xf32>
    %12 = arith.addf %6, %11 : vector<8x128xf32>
    %13 = vector.extract_strided_slice %0 {offsets = [0, 2], sizes = [8, 1], strides = [1, 1]} : vector<8x3xf32> to vector<8x1xf32>
    %14 = vector.extract_strided_slice %1 {offsets = [2, 0], sizes = [1, 128], strides = [1, 1]} : vector<3x128xf32> to vector<1x128xf32>
    %15 = vector.broadcast %13 : vector<8x1xf32> to vector<8x128xf32>
    %16 = vector.broadcast %14 : vector<1x128xf32> to vector<8x128xf32>
    %17 = arith.mulf %15, %16 : vector<8x128xf32>
    %18 = arith.addf %12, %17 : vector<8x128xf32>
    %c0_3 = arith.constant 0 : index
    %c0_4 = arith.constant 0 : index
    %19 = vector.load %arg3[%c0_3, %c0_4] : memref<1x128xf32, #tpu.memory_space<vmem>>, vector<1x128xf32>
    %20 = vector.broadcast %19 : vector<1x128xf32> to vector<8x128xf32>
    %21 = arith.addf %18, %20 : vector<8x128xf32>
    %cst = arith.constant 0.000000e+00 : f32
    %22 = vector.broadcast %cst : f32 to vector<8x128xf32>
    %23 = arith.maximumf %21, %22 : vector<8x128xf32>
    %c0_5 = arith.constant 0 : index
    %c0_6 = arith.constant 0 : index
    %24 = vector.load %arg4[%c0_5, %c0_6] : memref<128x128xf32, #tpu.memory_space<vmem>>, vector<128x128xf32>
    %cst_7 = arith.constant dense<0.000000e+00> : vector<8x128xf32>
    %25 = tpu.matmul %23, %24, %cst_7 {dimension_numbers = #tpu.dot_dimension_numbers<[1], [0], [0], [1], [0, 0, 1, 1], [], []>} : vector<8x128xf32>, vector<128x128xf32>, vector<8x128xf32> -> vector<8x128xf32>
    %c0_8 = arith.constant 0 : index
    %c0_9 = arith.constant 0 : index
    %26 = vector.load %arg5[%c0_8, %c0_9] : memref<1x128xf32, #tpu.memory_space<vmem>>, vector<1x128xf32>
    %27 = vector.broadcast %26 : vector<1x128xf32> to vector<8x128xf32>
    %28 = arith.addf %25, %27 : vector<8x128xf32>
    %cst_10 = arith.constant 0.000000e+00 : f32
    %29 = vector.broadcast %cst_10 : f32 to vector<8x128xf32>
    %30 = arith.maximumf %28, %29 : vector<8x128xf32>
    %c0_11 = arith.constant 0 : index
    %c0_12 = arith.constant 0 : index
    %31 = vector.load %arg6[%c0_11, %c0_12] : memref<128x8xf32, #tpu.memory_space<vmem>>, vector<128x8xf32>
    %cst_13 = arith.constant dense<0.000000e+00> : vector<8x8xf32>
    %32 = tpu.matmul %30, %31, %cst_13 {dimension_numbers = #tpu.dot_dimension_numbers<[1], [0], [0], [1], [0, 0, 1, 1], [], []>} : vector<8x128xf32>, vector<128x8xf32>, vector<8x8xf32> -> vector<8x8xf32>
    %c0_14 = arith.constant 0 : index
    %c0_15 = arith.constant 0 : index
    %33 = vector.load %arg7[%c0_14, %c0_15] : memref<1x8xf32, #tpu.memory_space<vmem>>, vector<1x8xf32>
    %34 = vector.broadcast %33 : vector<1x8xf32> to vector<8x8xf32>
    %35 = arith.addf %32, %34 : vector<8x8xf32>
    %c0_16 = arith.constant 0 : index
    %c0_17 = arith.constant 0 : index
    %36 = vector.load %arg8[%c0_16, %c0_17] : memref<8x8xf32, #tpu.memory_space<vmem>>, vector<8x8xf32>
    tpu.vector_store %arg8[%c0_16, %c0_17], %35 {strides = array<i32>} : memref<8x8xf32, #tpu.memory_space<vmem>>, vector<8x8xf32>,
    return
  }
  func.func @transform_0(%arg0: i32) -> (i32, i32) {
    %c0_i32 = arith.constant 0 : i32
    %c0_i32_0 = arith.constant 0 : i32
    return %arg0, %c0_i32 : i32, i32
  }
  func.func @transform_1(%arg0: i32) -> (i32, i32) {
    %c0_i32 = arith.constant 0 : i32
    %c0_i32_0 = arith.constant 0 : i32
    %c0_i32_1 = arith.constant 0 : i32
    return %c0_i32, %c0_i32_0 : i32, i32
  }
  func.func @transform_2(%arg0: i32) -> (i32, i32) {
    %c0_i32 = arith.constant 0 : i32
    %c0_i32_0 = arith.constant 0 : i32
    %c0_i32_1 = arith.constant 0 : i32
    return %c0_i32, %c0_i32_0 : i32, i32
  }
  func.func @transform_3(%arg0: i32) -> (i32, i32) {
    %c0_i32 = arith.constant 0 : i32
    %c0_i32_0 = arith.constant 0 : i32
    %c0_i32_1 = arith.constant 0 : i32
    return %c0_i32, %c0_i32_0 : i32, i32
  }
  func.func @transform_4(%arg0: i32) -> (i32, i32) {
    %c0_i32 = arith.constant 0 : i32
    %c0_i32_0 = arith.constant 0 : i32
    %c0_i32_1 = arith.constant 0 : i32
    return %c0_i32, %c0_i32_0 : i32, i32
  }
  func.func @transform_5(%arg0: i32) -> (i32, i32) {
    %c0_i32 = arith.constant 0 : i32
    %c0_i32_0 = arith.constant 0 : i32
    %c0_i32_1 = arith.constant 0 : i32
    return %c0_i32, %c0_i32_0 : i32, i32
  }
  func.func @transform_6(%arg0: i32) -> (i32, i32) {
    %c0_i32 = arith.constant 0 : i32
    %c0_i32_0 = arith.constant 0 : i32
    %c0_i32_1 = arith.constant 0 : i32
    return %c0_i32, %c0_i32_0 : i32, i32
  }
  func.func @transform_7(%arg0: i32) -> (i32, i32) {
    %c0_i32 = arith.constant 0 : i32
    %c0_i32_0 = arith.constant 0 : i32
    return %arg0, %c0_i32 : i32, i32
  }
}

</mosaic_0001>

<bundles_post_ra>
// kernel: mlp_forward.1
= control target key start
LH: loop header
LB: loop body
LE: loop exit
PB: predicated region body
PF: predicated region fallthrough
CT: control target
= control target key end

     0   :  { %v376_v0 = vmov 0   ;;  %v377_v2 = vmov 2   ;;  %v378_v4 = vmov 0.0   ;;  %v379_v7 = vmov 1   ;;  %s569_s0 = inlined_call_operand.vmem [shape: f32[8,3], index: 0, kind: input, shape index: {}]   ;;  %s570_s3 = inlined_call_operand.vmem [shape: f32[128,128], index: 3, kind: input, shape index: {}]   ;;  %s571_s5 = inlined_call_operand.vmem [shape: f32[128,8], index: 5, kind: input, shape index: {}]   ;;  %s572_s1 = inlined_call_operand.vmem [shape: f32[3,128], index: 1, kind: input, shape index: {}]   ;;  %s573_s2 = inlined_call_operand.vmem [shape: f32[1,128], index: 2, kind: input, shape index: {}]   ;;  %s574_s4 = inlined_call_operand.vmem [shape: f32[1,128], index: 4, kind: input, shape index: {}]   ;;  %s575_s6 = inlined_call_operand.vmem [shape: f32[1,8], index: 6, kind: input, shape index: {}]   ;;  %s576_s7 = inlined_call_operand.vmem [shape: f32[8,8], index: 7, kind: output, shape index: {}]  }
   0x1   :  { %372 = vset.pattern.permute.xlu0 %v376_v0  ;;  %v26_v1 = vld [vmem:[%s569_s0] sm:$0xff]  ;;  %374 = vset.pattern.permute.xlu1 %v377_v2  ;;  %v82_v3 = vld [vmem:[%s570_s3 + $0x78] sm:$0xff]  ;;  %v81_v5 = vld [vmem:[%s570_s3 + $0x70] sm:$0xff]  ;;  %vm380_vm0 = vmmov 0   ;;  %v33_v34 = vlaneseq  ;;  %vm254_vm1 = vcmask 64512  }
   0x2   :  { %30 = vperm.xlu0 %372, %v26_v1   ;;  %49 = vperm.xlu1 %374, %v26_v1   ;;  %v80_v6 = vld [vmem:[%s570_s3 + $0x68] sm:$0xff]  ;;  %v79_v8 = vld [vmem:[%s570_s3 + $0x60] sm:$0xff]  ;;  %v78_v9 = vld [vmem:[%s570_s3 + $0x58] sm:$0xff] }
   0x3   :  { %297 = vmatprep.subr.mxu0 %v378_v4  ;;  %332 = vmatprep.subr.mxu1 %v378_v4  ;;  %v77_v10 = vld [vmem:[%s570_s3 + $0x50] sm:$0xff]  ;;  %v76_v11 = vld [vmem:[%s570_s3 + $0x48] sm:$0xff]  ;;  %v176_v12 = vld [vmem:[%s571_s5 + $0x78] sm:$0xff]  ;;  %v34_v35 = vshrl.u32 %v33_v34, 7 }
   0x4   :  { %298 = vmatpush3.msra.mxu0 %v82_v3  ;;  %329 = vmatprep.mubr.msk.f32.mxu0 %vm380_vm0, %v378_v4  ;;  %v175_v13 = vld [vmem:[%s571_s5 + $0x70] sm:$0xff]  ;;  %v75_v14 = vld [vmem:[%s570_s3 + $0x40] sm:$0xff]  ;;  %v174_v15 = vld [vmem:[%s571_s5 + $0x68] sm:$0xff] }
   0x5   :  { %299 = vmatprep.subr.mxu0 %v378_v4  ;;  %364 = vmatprep.mubr.msk.f32.mxu1 %vm380_vm0, %v378_v4  ;;  %v74_v16 = vld [vmem:[%s570_s3 + $0x38] sm:$0xff]  ;;  %v173_v17 = vld [vmem:[%s571_s5 + $0x60] sm:$0xff]  ;;  %v73_v18 = vld [vmem:[%s570_s3 + $0x30] sm:$0xff]  ;;  %v35_v36 = vsub.s32 0, %v34_v35  ;;  %v44_v37 = vsub.s32 1, %v34_v35  ;;  %v54_v38 = vsub.s32 2, %v34_v35 }
   0x6   :  { %373 = vset.pattern.permute.xlu0 %v379_v7  ;;  %300 = vmatpush3.msra.mxu0 %v81_v5  ;;  %v172_v19 = vld [vmem:[%s571_s5 + $0x58] sm:$0xff]  ;;  %v72_v20 = vld [vmem:[%s570_s3 + $0x28] sm:$0xff]  ;;  %v171_v21 = vld [vmem:[%s571_s5 + $0x50] sm:$0xff] }
   0x7   :  { %39 = vperm.xlu0 %373, %v26_v1   ;;  %301 = vmatprep.subr.mxu0 %v378_v4  ;;  %v71_v22 = vld [vmem:[%s570_s3 + $0x20] sm:$0xff]  ;;  %v170_v23 = vld [vmem:[%s571_s5 + $0x48] sm:$0xff]  ;;  %v70_v24 = vld [vmem:[%s570_s3 + $0x18] sm:$0xff] }
   0x8   :  { %302 = vmatpush3.msra.mxu0 %v80_v6  ;;  %333 = vmatpush3.msra.mxu1 %v176_v12  ;;  %v169_v25 = vld [vmem:[%s571_s5 + $0x40] sm:$0xff]  ;;  %v69_v26 = vld [vmem:[%s570_s3 + $0x10] sm:$0xff]  ;;  %v168_v27 = vld [vmem:[%s571_s5 + $0x38] sm:$0xff] }
   0x9   :  { %303 = vmatprep.subr.mxu0 %v378_v4  ;;  %334 = vmatprep.subr.mxu1 %v378_v4  ;;  %v68_v28 = vld [vmem:[%s570_s3 + $0x8] sm:$0xff]  ;;  %v167_v29 = vld [vmem:[%s571_s5 + $0x30] sm:$0xff]  ;;  %v67_v30 = vld [vmem:[%s570_s3] sm:$0xff] }
   0xa   :  { %304 = vmatpush3.msra.mxu0 %v79_v8  ;;  %335 = vmatpush3.msra.mxu1 %v175_v13  ;;  %v166_v31 = vld [vmem:[%s571_s5 + $0x28] sm:$0xff]  ;;  %v165_v32 = vld [vmem:[%s571_s5 + $0x20] sm:$0xff]  ;;  %v164_v33 = vld [vmem:[%s571_s5 + $0x18] sm:$0xff] }
   0xb   :  { %305 = vmatprep.subr.mxu0 %v378_v4  ;;  %375 = vset.pattern.permute.xlu0 %v377_v2  ;;  %v27_v39 = vld [vmem:[%s572_s1] sm:$0x7]  ;;  %v163_v54 = vld [vmem:[%s571_s5 + $0x10] sm:$0xff]  ;;  %v162_v55 = vld [vmem:[%s571_s5 + $0x8] sm:$0xff] }
   0xc   :  { %306 = vmatpush3.msra.mxu0 %v78_v9  ;;  %336 = vmatprep.subr.mxu1 %v378_v4  ;;  %v36_v41 = vrot.slane %v27_v39, %v35_v36  ;;  %v45_v42 = vrot.slane %v27_v39, %v44_v37  ;;  %v55_v43 = vrot.slane %v27_v39, %v54_v38  ;;  %v260_v50 = vld [vmem:[%s573_s2] ss:$0 sm:$0xff] }
   0xd   :  { %307 = vmatprep.subr.mxu0 %v378_v4  ;;  %337 = vmatpush3.msra.mxu1 %v174_v15  ;;  %v161_v56 = vld [vmem:[%s571_s5] sm:$0xff] }
   0xe   :  { %308 = vmatpush3.msra.mxu0 %v77_v10  ;;  %338 = vmatprep.subr.mxu1 %v378_v4  ;;  %v261_v57 = vld [vmem:[%s574_s4] ss:$0 sm:$0xff] }
   0xf   :  { %309 = vmatprep.subr.mxu0 %v378_v4  ;;  %339 = vmatpush3.msra.mxu1 %v173_v17  ;;  %v262_v62 = vld [vmem:[%s575_s6] ss:$0 sm:$0xff] }
  0x10   :  { %310 = vmatpush3.msra.mxu0 %v76_v11  ;;  %340 = vmatprep.subr.mxu1 %v378_v4 }
  0x11   :  { %311 = vmatprep.subr.mxu0 %v378_v4  ;;  %341 = vmatpush3.msra.mxu1 %v172_v19 }
  0x12   :  { %312 = vmatpush3.msra.mxu0 %v75_v14  ;;  %342 = vmatprep.subr.mxu1 %v378_v4 }
  0x13   :  { %313 = vmatprep.subr.mxu0 %v378_v4  ;;  %343 = vmatpush3.msra.mxu1 %v171_v21 }
  0x14   :  { %314 = vmatpush3.msra.mxu0 %v74_v16  ;;  %344 = vmatprep.subr.mxu1 %v378_v4 }
  0x15   :  { %315 = vmatprep.subr.mxu0 %v378_v4  ;;  %345 = vmatpush3.msra.mxu1 %v170_v23 }
  0x16   :  { %316 = vmatpush3.msra.mxu0 %v73_v18  ;;  %346 = vmatprep.subr.mxu1 %v378_v4 }
  0x17   :  { %317 = vmatprep.subr.mxu0 %v378_v4  ;;  %347 = vmatpush3.msra.mxu1 %v169_v25 }
  0x18   :  { %318 = vmatpush3.msra.mxu0 %v72_v20  ;;  %348 = vmatprep.subr.mxu1 %v378_v4 }
  0x19   :  { %319 = vmatprep.subr.mxu0 %v378_v4  ;;  %349 = vmatpush3.msra.mxu1 %v168_v27 }
  0x1a   :  { %320 = vmatpush3.msra.mxu0 %v71_v22  ;;  %350 = vmatprep.subr.mxu1 %v378_v4 }
  0x1b   :  { %321 = vmatprep.subr.mxu0 %v378_v4  ;;  %351 = vmatpush3.msra.mxu1 %v167_v29 }
  0x1c   :  { %322 = vmatpush3.msra.mxu0 %v70_v24  ;;  %352 = vmatprep.subr.mxu1 %v378_v4 }
  0x1d   :  { %323 = vmatprep.subr.mxu0 %v378_v4  ;;  %353 = vmatpush3.msra.mxu1 %v166_v31 }
  0x1e   :  { %324 = vmatpush3.msra.mxu0 %v69_v26  ;;  %354 = vmatprep.subr.mxu1 %v378_v4 }
  0x1f   :  { %325 = vmatprep.subr.mxu0 %v378_v4  ;;  %355 = vmatpush3.msra.mxu1 %v165_v32 }
  0x20   :  { %326 = vmatpush3.msra.mxu0 %v68_v28  ;;  %356 = vmatprep.subr.mxu1 %v378_v4 }
  0x21   :  { %327 = vmatprep.subr.mxu0 %v378_v4  ;;  %357 = vmatpush3.msra.mxu1 %v164_v33 }
  0x22   :  { %328 = vmatpush3.msra.mxu0 %v67_v30  ;;  %358 = vmatprep.subr.mxu1 %v378_v4 }
  0x23   :  { %359 = vmatpush3.msra.mxu1 %v163_v54 }
  0x24   :  { %360 = vmatprep.subr.mxu1 %v378_v4 }
  0x25   :  { %361 = vmatpush3.msra.mxu1 %v162_v55 }
  0x26   :  { %362 = vmatprep.subr.mxu1 %v378_v4 }
  0x27   :  { %363 = vmatpush3.msra.mxu1 %v161_v56 }
  0x7d   :  { %v31_v40 = vpop.permute.xlu0 %30  ;;  %v50_v44 = vpop.permute.xlu1 %49 }
  0x7e   :  { %v37_v46 = vmul.f32 %v36_v41, %v31_v40  ;;  %v56_v48 = vmul.f32 %v55_v43, %v50_v44 }
  0x82   :  { %v40_v45 = vpop.permute.xlu0 %39 }
  0x83   :  { %v46_v47 = vmul.f32 %v45_v42, %v40_v45 }
  0x85   :  { %v47_v49 = vadd.f32 %v46_v47, %v37_v46 }
  0x87   :  { %v57_v51 = vadd.f32 %v56_v48, %v47_v49 }
  0x89   :  { %v65_v52 = vadd.f32 %v260_v50, %v57_v51 }
  0x8b   :  { %v66_v53 = vmax.f32 %v65_v52, 0.0 }
  0x8d   :  { %330 = vmatmul.mubr.f32.vlgmr.msra.gmra.mxu0 %v66_v53 }
 0x14d   :  { %v156_v58 = vpop.f32.mrf.mxu0 }
 0x14e   :  { %v157_v59 = vadd.f32 %v261_v57, %v156_v58 }
 0x14f   :  { %v331_v60 = vpop.f32.mrf.mxu0 }
 0x150   :  { %v160_v61 = vmax.f32 %v157_v59, 0.0 }
 0x152   :  { %365 = vmatmul.mubr.f32.vlgmr.msra.gmra.mxu1 %v160_v61 }
 0x212   :  { %v250_v63 = vpop.f32.mrf.mxu1 }
 0x213   :  { %v251_v0 = vadd.f32 %v262_v62, %v250_v63 }
 0x214   :  { %v366_v1 = vpop.f32.mrf.mxu1 }
 0x215   :  { %255 = vst.msk [vmem:[%s576_s7] sm:$0xff] %vm254_vm1, %v251_v0 }

</bundles_post_ra>
